<compile_context>
chip_gen: v7x
topology: tpu7x:2x2x1
jax: 0.10.0
libtpu: 0.0.40
codegen_flags: <defaults>
</compile_context>

<pallas_src>
import functools

import jax
import jax.numpy as jnp
from jax.experimental import pallas as pl
from jax.experimental.pallas import tpu as pltpu


def _pick_block_s(s: int, e: int, n_q: int, vmem_budget_bytes: int = 24 << 20) -> int:
    """Rows per cache tile.

    Must be a multiple of 128 (it is the lane dim of the (n_q, block_s) attn^T
    output block) or the full S.  Sized so double-buffered cache + attn tiles
    stay inside every generation's VMEM (v7x has only 64 MiB per core), and
    kept <= S//2 when possible so the 'parallel' grid has >= 2 steps.
    """
    if s % 128 != 0 or s <= 256:
        # Small / awkward caches: single full-S tile (also the toy-demo path).
        # TODO(synk): pad S up to a multiple of 128 in the wrapper for large
        # caches whose length is not 128-divisible (cdiv grid + masked tail).
        return s
    bytes_per_row = 2 * 4 * (e + n_q)            # double-buffered cache + attn tiles
    max_rows = max(128, vmem_budget_bytes // bytes_per_row)
    max_rows = min(max_rows, s // 2)             # >= 2 grid steps (megacore, pipelining)
    max_rows = max(128, (max_rows // 128) * 128)
    best = 128
    cand = 128
    while cand <= max_rows:
        if s % cand == 0:
            best = cand
        cand += 128
    return best


def _stateful_kernel(pos_ref,        # SMEM in : (n_pos,) int32  positions
                     cache_ref,      # VMEM in : (TS, E) f32     cache tile (read-only)
                     kval_ref,       # VMEM in : (n_pos, E) f32
                     q_ref,          # VMEM in : (n_q, E) f32
                     attn_t_ref,     # VMEM out: (n_q, TS) f32   attn^T tile (lane-dense)
                     cache_hbm_ref,  # ANY  out: (S, E) f32      raw HBM, aliased w/ cache in
                     dma_sem,        # scratch : DMA semaphore
                     *, n_pos: int, n_q: int, block_s: int):
    row0 = pl.program_id(0) * block_s

    # attn^T tile = q @ cache_tile^T : contract the shared E axis directly
    # (native NT MXU form, no transpose) with f32 accumulation.  Uses the OLD
    # cache values; rows touched by index_put_ are patched below.
    attn_t_ref[...] = jax.lax.dot_general(
        q_ref[...], cache_ref[...],
        dimension_numbers=(((1,), (1,)), ((), ())),
        preferred_element_type=jnp.float32)
    # TODO(synk): for production sizes store cache/q in bf16 and feed bf16 MXU
    # operands (preferred_element_type=f32) — halves the dominant HBM read but
    # changes numerics vs. the f32 reference.

    # Patch the attn^T columns belonging to rows overwritten by k_val.  Only
    # tiles that actually contain one of the n_pos positions do any vector work.
    in_tile = [
        jnp.logical_and(pos_ref[i] >= row0, pos_ref[i] < row0 + block_s)
        for i in range(n_pos)
    ]
    any_in_tile = functools.reduce(jnp.logical_or, in_tile)

    @pl.when(any_in_tile)
    def _():
        # (n_q, n_pos) patch columns: q @ k_val^T.
        patch = jax.lax.dot_general(
            q_ref[...], kval_ref[...],
            dimension_numbers=(((1,), (1,)), ((), ())),
            preferred_element_type=jnp.float32)
        lane = jax.lax.broadcasted_iota(jnp.int32, (n_q, block_s), 1)
        acc = attn_t_ref[...]
        for i in range(n_pos):                  # later writes win for duplicates
            local = pos_ref[i] - row0
            # Out-of-tile positions match no lane -> natural no-op.
            acc = jnp.where(lane == local, patch[:, i:i + 1], acc)
        attn_t_ref[...] = acc

    # index_put_: write ONLY the n_pos touched rows back to the aliased cache
    # in HBM (everything else is untouched thanks to the alias) instead of
    # streaming the whole cache back out.  Done once, at grid step 0.
    @pl.when(pl.program_id(0) == 0)
    def _():
        for i in range(n_pos):                  # sequential -> last write wins
            p = pos_ref[i]
            cp = pltpu.make_async_copy(
                kval_ref.at[pl.ds(i, 1), :],
                cache_hbm_ref.at[pl.ds(p, 1), :],
                dma_sem)
            cp.start()
            cp.wait()
    # TODO(synk): negative / out-of-range positions (PyTorch index_put_
    # wrap-around) are not handled; positions must lie in [0, S).


def stateful_model_forward(cache, q, k_val, input_pos):
    """Functional StatefulModel.forward.

    Returns (attn, new_cache); attn has the PyTorch (max_seq_len, n_q) layout.
    The cache output is aliased onto the cache input so only the touched rows
    hit HBM; in production, jit the caller with the cache donated
    (donate_argnums) so XLA doesn't insert a defensive copy of the buffer.
    """
    S, E = cache.shape
    n_q = q.shape[0]
    n_pos = k_val.shape[0]
    block_s = _pick_block_s(S, E, n_q)
    grid = (S // block_s,)

    kernel = functools.partial(_stateful_kernel, n_pos=n_pos, n_q=n_q, block_s=block_s)

    attn_t, new_cache = pl.pallas_call(
        kernel,
        grid=grid,
        in_specs=[
            pl.BlockSpec(memory_space=pltpu.MemorySpace.SMEM),   # input_pos scalars
            pl.BlockSpec((block_s, E), lambda s: (s, 0)),        # cache tile (read)
            pl.BlockSpec((n_pos, E), lambda s: (0, 0)),          # k_val (resident)
            pl.BlockSpec((n_q, E), lambda s: (0, 0)),            # q (resident)
        ],
        out_specs=[
            pl.BlockSpec((n_q, block_s), lambda s: (0, s)),      # attn^T tile (lane-dense)
            pl.BlockSpec(memory_space=pl.ANY),                   # cache out: raw HBM
        ],
        out_shape=(
            jax.ShapeDtypeStruct((n_q, S), jnp.float32),
            jax.ShapeDtypeStruct((S, E), jnp.float32),
        ),
        scratch_shapes=[pltpu.SemaphoreType.DMA(())],
        # Cache input (index 1: input_pos=0, cache=1, k_val=2, q=3) IS the cache
        # output (index 1).  Required for correctness: the kernel writes only
        # the n_pos updated rows; the alias keeps every other row intact.
        input_output_aliases={1: 1},
        compiler_params=pltpu.CompilerParams(
            dimension_semantics=("parallel",),        # shard S-tiles across cores (v7x)
            vmem_limit_bytes=48 * 1024 * 1024,        # > default scoped limit, < v7x physical
        ),
    )(input_pos, cache, k_val, q)

    # PyTorch layout is (max_seq_len, n_q); the kernel keeps the long S axis on
    # lanes.  Skip this transpose if the consumer accepts the (n_q, S) layout.
    return attn_t.T, new_cache


if __name__ == "__main__":
    embedding_dim = 32
    max_seq_len = 8
    n_q = 2       # number of query rows
    n_pos = 2     # number of cache rows being written

    key = jax.random.PRNGKey(0)
    kq, kk, kc = jax.random.split(key, 3)

    # The module initializes the buffer to zeros; pre-fill with random values
    # so the scatter is actually exercised ("state carried across calls").
    cache = jax.random.normal(kc, (max_seq_len, embedding_dim), dtype=jnp.float32)
    q = jax.random.normal(kq, (n_q, embedding_dim), dtype=jnp.float32)
    k_val = jax.random.normal(kk, (n_pos, embedding_dim), dtype=jnp.float32)
    input_pos = jnp.array([1, 5], dtype=jnp.int32)

    attn, new_cache = stateful_model_forward(cache, q, k_val, input_pos)
    attn = jax.block_until_ready(attn)
    new_cache = jax.block_until_ready(new_cache)

    # Pure-JAX reference (index_put_ then mm).
    ref_cache = cache.at[input_pos, :].set(k_val)
    ref_attn = ref_cache @ q.T

    assert attn.shape == (max_seq_len, n_q)
    assert new_cache.shape == (max_seq_len, embedding_dim)
    assert jnp.allclose(new_cache, ref_cache, atol=1e-6), "cache mismatch"
    assert jnp.allclose(attn, ref_attn, atol=1e-5), "attn mismatch"

    print("KERNEL_OK")
</pallas_src>

<mosaic_0001>
module attributes {stable_mosaic.version = 11 : i64} {
  func.func @_stateful_kernel(%arg0: i32, %arg1: memref<2xi32, #tpu.memory_space<smem>>, %arg2: memref<8x32xf32, #tpu.memory_space<vmem>>, %arg3: memref<2x32xf32, #tpu.memory_space<vmem>>, %arg4: memref<2x32xf32, #tpu.memory_space<vmem>>, %arg5: memref<2x8xf32, #tpu.memory_space<vmem>>, %arg6: memref<8x32xf32, #tpu.memory_space<any>>, %arg7: memref<!tpu.dma_semaphore, #tpu.memory_space<semaphore_mem>>) attributes {dimension_semantics = [#tpu.dimension_semantics<parallel>], iteration_bounds = array<i64: 1>, scalar_prefetch = 0 : i64, scratch_operands = 1 : i64, tpu.core_type = #tpu.core_type<tc>, window_params = [{transform_indices = @transform_0, window_bounds = array<i64: 2>}, {transform_indices = @transform_1, window_bounds = array<i64: 8, 32>}, {pipeline_mode = #tpu.pipeline_mode<synchronous>, transform_indices = @transform_2, window_bounds = array<i64: 2, 32>}, {pipeline_mode = #tpu.pipeline_mode<synchronous>, transform_indices = @transform_3, window_bounds = array<i64: 2, 32>}, {transform_indices = @transform_4, window_bounds = array<i64: 2, 8>}, {}]} {
    %c8_i32 = arith.constant 8 : i32
    %0 = arith.muli %arg0, %c8_i32 : i32
    %c0 = arith.constant 0 : index
    %c0_0 = arith.constant 0 : index
    %1 = vector.load %arg4[%c0, %c0_0] : memref<2x32xf32, #tpu.memory_space<vmem>>, vector<2x32xf32>
    %c0_1 = arith.constant 0 : index
    %c0_2 = arith.constant 0 : index
    %2 = vector.load %arg2[%c0_1, %c0_2] : memref<8x32xf32, #tpu.memory_space<vmem>>, vector<8x32xf32>
    %cst = arith.constant dense<0.000000e+00> : vector<2x8xf32>
    %3 = tpu.matmul %1, %2, %cst {dimension_numbers = #tpu.dot_dimension_numbers<[1], [1], [0], [0], [0, 0, 1, 0], [], []>} : vector<2x32xf32>, vector<8x32xf32>, vector<2x8xf32> -> vector<2x8xf32>
    %c0_3 = arith.constant 0 : index
    %c0_4 = arith.constant 0 : index
    %4 = vector.load %arg5[%c0_3, %c0_4] : memref<2x8xf32, #tpu.memory_space<vmem>>, vector<2x8xf32>
    tpu.vector_store %arg5[%c0_3, %c0_4], %3 {strides = array<i32>} : memref<2x8xf32, #tpu.memory_space<vmem>>, vector<2x8xf32>,
    %c0_5 = arith.constant 0 : index
    %5 = memref.load %arg1[%c0_5] : memref<2xi32, #tpu.memory_space<smem>>
    %6 = arith.cmpi sge, %5, %0 : i32
    %c0_6 = arith.constant 0 : index
    %7 = memref.load %arg1[%c0_6] : memref<2xi32, #tpu.memory_space<smem>>
    %c8_i32_7 = arith.constant 8 : i32
    %8 = arith.addi %0, %c8_i32_7 : i32
    %9 = arith.cmpi slt, %7, %8 : i32
    %10 = arith.andi %6, %9 : i1
    %c1 = arith.constant 1 : index
    %11 = memref.load %arg1[%c1] : memref<2xi32, #tpu.memory_space<smem>>
    %12 = arith.cmpi sge, %11, %0 : i32
    %c1_8 = arith.constant 1 : index
    %13 = memref.load %arg1[%c1_8] : memref<2xi32, #tpu.memory_space<smem>>
    %c8_i32_9 = arith.constant 8 : i32
    %14 = arith.addi %0, %c8_i32_9 : i32
    %15 = arith.cmpi slt, %13, %14 : i32
    %16 = arith.andi %12, %15 : i1
    %17 = arith.ori %10, %16 : i1
    %18 = arith.extui %17 : i1 to i32
    %c0_i32 = arith.constant 0 : i32
    %19 = arith.cmpi ne, %18, %c0_i32 : i32
    scf.if %19 {
      %c0_12 = arith.constant 0 : index
      %c0_13 = arith.constant 0 : index
      %23 = vector.load %arg4[%c0_12, %c0_13] : memref<2x32xf32, #tpu.memory_space<vmem>>, vector<2x32xf32>
      %c0_14 = arith.constant 0 : index
      %c0_15 = arith.constant 0 : index
      %24 = vector.load %arg3[%c0_14, %c0_15] : memref<2x32xf32, #tpu.memory_space<vmem>>, vector<2x32xf32>
      %cst_16 = arith.constant dense<0.000000e+00> : vector<2x2xf32>
      %25 = tpu.matmul %23, %24, %cst_16 {dimension_numbers = #tpu.dot_dimension_numbers<[1], [1], [0], [0], [0, 0, 1, 0], [], []>} : vector<2x32xf32>, vector<2x32xf32>, vector<2x2xf32> -> vector<2x2xf32>
      %26 = tpu.iota {dimensions = array<i32: 1>} : vector<2x8xi32>
      %c0_17 = arith.constant 0 : index
      %c0_18 = arith.constant 0 : index
      %27 = vector.load %arg5[%c0_17, %c0_18] : memref<2x8xf32, #tpu.memory_space<vmem>>, vector<2x8xf32>
      %c0_19 = arith.constant 0 : index
      %28 = memref.load %arg1[%c0_19] : memref<2xi32, #tpu.memory_space<smem>>
      %29 = arith.subi %28, %0 : i32
      %30 = vector.broadcast %29 : i32 to vector<2x8xi32>
      %31 = arith.cmpi eq, %26, %30 : vector<2x8xi32>
      %32 = vector.extract_strided_slice %25 {offsets = [0, 0], sizes = [2, 1], strides = [1, 1]} : vector<2x2xf32> to vector<2x1xf32>
      %33 = vector.shape_cast %32 : vector<2x1xf32> to vector<2x1xf32>
      %34 = vector.broadcast %33 : vector<2x1xf32> to vector<2x8xf32>
      %35 = arith.select %31, %34, %27 : vector<2x8xi1>, vector<2x8xf32>
      %c1_20 = arith.constant 1 : index
      %36 = memref.load %arg1[%c1_20] : memref<2xi32, #tpu.memory_space<smem>>
      %37 = arith.subi %36, %0 : i32
      %38 = vector.broadcast %37 : i32 to vector<2x8xi32>
      %39 = arith.cmpi eq, %26, %38 : vector<2x8xi32>
      %40 = vector.extract_strided_slice %25 {offsets = [0, 1], sizes = [2, 1], strides = [1, 1]} : vector<2x2xf32> to vector<2x1xf32>
      %41 = vector.shape_cast %40 : vector<2x1xf32> to vector<2x1xf32>
      %42 = vector.broadcast %41 : vector<2x1xf32> to vector<2x8xf32>
      %43 = arith.select %39, %42, %35 : vector<2x8xi1>, vector<2x8xf32>
      %c0_21 = arith.constant 0 : index
      %c0_22 = arith.constant 0 : index
      %44 = vector.load %arg5[%c0_21, %c0_22] : memref<2x8xf32, #tpu.memory_space<vmem>>, vector<2x8xf32>
      tpu.vector_store %arg5[%c0_21, %c0_22], %43 {strides = array<i32>} : memref<2x8xf32, #tpu.memory_space<vmem>>, vector<2x8xf32>,
    } else {
    }
    %c0_i32_10 = arith.constant 0 : i32
    %20 = arith.cmpi eq, %arg0, %c0_i32_10 : i32
    %21 = arith.extui %20 : i1 to i32
    %c0_i32_11 = arith.constant 0 : i32
    %22 = arith.cmpi ne, %21, %c0_i32_11 : i32
    scf.if %22 {
      %c0_12 = arith.constant 0 : index
      %23 = memref.load %arg1[%c0_12] : memref<2xi32, #tpu.memory_space<smem>>
      %c0_i32_13 = arith.constant 0 : i32
      %c0_i32_14 = arith.constant 0 : i32
      %24 = tpu.memref_slice %arg3[%c0_i32_13, %c0_i32_14] : memref<2x32xf32, #tpu.memory_space<vmem>> -> memref<1x32xf32, #tpu.memory_space<vmem>>
      %c0_i32_15 = arith.constant 0 : i32
      %25 = tpu.memref_slice %arg6[%23, %c0_i32_15] : memref<8x32xf32, #tpu.memory_space<any>> -> memref<1x32xf32, #tpu.memory_space<any>>
      tpu.enqueue_dma source(%24 : memref<1x32xf32, #tpu.memory_space<vmem>>) target(%25 : memref<1x32xf32, #tpu.memory_space<any>>) target_semaphore(%arg7 : memref<!tpu.dma_semaphore, #tpu.memory_space<semaphore_mem>>)
      %c0_i32_16 = arith.constant 0 : i32
      %c0_i32_17 = arith.constant 0 : i32
      %26 = tpu.memref_slice %arg3[%c0_i32_16, %c0_i32_17] : memref<2x32xf32, #tpu.memory_space<vmem>> -> memref<1x32xf32, #tpu.memory_space<vmem>>
      %c0_i32_18 = arith.constant 0 : i32
      %27 = tpu.memref_slice %arg6[%23, %c0_i32_18] : memref<8x32xf32, #tpu.memory_space<any>> -> memref<1x32xf32, #tpu.memory_space<any>>
      tpu.wait_dma2 semaphore(%arg7 : memref<!tpu.dma_semaphore, #tpu.memory_space<semaphore_mem>>) src(%26 : memref<1x32xf32, #tpu.memory_space<vmem>>) dst(%27 : memref<1x32xf32, #tpu.memory_space<any>>)
      %c1_19 = arith.constant 1 : index
      %28 = memref.load %arg1[%c1_19] : memref<2xi32, #tpu.memory_space<smem>>
      %c1_i32 = arith.constant 1 : i32
      %c0_i32_20 = arith.constant 0 : i32
      %29 = tpu.memref_slice %arg3[%c1_i32, %c0_i32_20] : memref<2x32xf32, #tpu.memory_space<vmem>> -> memref<1x32xf32, #tpu.memory_space<vmem>>
      %c0_i32_21 = arith.constant 0 : i32
      %30 = tpu.memref_slice %arg6[%28, %c0_i32_21] : memref<8x32xf32, #tpu.memory_space<any>> -> memref<1x32xf32, #tpu.memory_space<any>>
      tpu.enqueue_dma source(%29 : memref<1x32xf32, #tpu.memory_space<vmem>>) target(%30 : memref<1x32xf32, #tpu.memory_space<any>>) target_semaphore(%arg7 : memref<!tpu.dma_semaphore, #tpu.memory_space<semaphore_mem>>)
      %c1_i32_22 = arith.constant 1 : i32
      %c0_i32_23 = arith.constant 0 : i32
      %31 = tpu.memref_slice %arg3[%c1_i32_22, %c0_i32_23] : memref<2x32xf32, #tpu.memory_space<vmem>> -> memref<1x32xf32, #tpu.memory_space<vmem>>
      %c0_i32_24 = arith.constant 0 : i32
      %32 = tpu.memref_slice %arg6[%28, %c0_i32_24] : memref<8x32xf32, #tpu.memory_space<any>> -> memref<1x32xf32, #tpu.memory_space<any>>
      tpu.wait_dma2 semaphore(%arg7 : memref<!tpu.dma_semaphore, #tpu.memory_space<semaphore_mem>>) src(%31 : memref<1x32xf32, #tpu.memory_space<vmem>>) dst(%32 : memref<1x32xf32, #tpu.memory_space<any>>)
    } else {
    }
    return
  }
  func.func @transform_0(%arg0: i32) -> i32 {
    %c0_i32 = arith.constant 0 : i32
    %c0_i32_0 = arith.constant 0 : i32
    return %c0_i32 : i32
  }
  func.func @transform_1(%arg0: i32) -> (i32, i32) {
    %c0_i32 = arith.constant 0 : i32
    %c0_i32_0 = arith.constant 0 : i32
    return %arg0, %c0_i32 : i32, i32
  }
  func.func @transform_2(%arg0: i32) -> (i32, i32) {
    %c0_i32 = arith.constant 0 : i32
    %c0_i32_0 = arith.constant 0 : i32
    %c0_i32_1 = arith.constant 0 : i32
    return %c0_i32, %c0_i32_0 : i32, i32
  }
  func.func @transform_3(%arg0: i32) -> (i32, i32) {
    %c0_i32 = arith.constant 0 : i32
    %c0_i32_0 = arith.constant 0 : i32
    %c0_i32_1 = arith.constant 0 : i32
    return %c0_i32, %c0_i32_0 : i32, i32
  }
  func.func @transform_4(%arg0: i32) -> (i32, i32) {
    %c0_i32 = arith.constant 0 : i32
    %c0_i32_0 = arith.constant 0 : i32
    return %c0_i32, %arg0 : i32, i32
  }
}

</mosaic_0001>

<bundles_post_ra>
// kernel: tpu_custom_call.1
= control target key start
LH: loop header
LB: loop body
LE: loop exit
PB: predicated region body
PF: predicated region fallthrough
CT: control target
= control target key end

     0   :  { %11 = vsyncpa [#allocation6], 0  ;;  %s567_s0 = inlined_call_operand.vmem [shape: s32[2], index: 0, kind: input, shape index: {}]   ;;  %s568_s1 = inlined_call_operand.hbm [shape: f32[8,32], index: 1, kind: input, shape index: {}, may-alias: {1,5}]   ;;  %s569_s2 = inlined_call_operand.vmem [shape: f32[2,32], index: 2, kind: input, shape index: {}]   ;;  %s570_s3 = inlined_call_operand.vmem [shape: f32[2,32], index: 3, kind: input, shape index: {}]   ;;  %s571_s4 = inlined_call_operand.hbm [shape: f32[2,8], index: 4, kind: output, shape index: {0}]   ;;  %s572_s5 = inlined_call_operand.hbm [shape: f32[8,32], index: 5, kind: output, shape index: {1}, may-alias: {1,5}]  }
   0x1   :  { %12 = vsyncpa [#allocation4], 0 }
   0x2   :  { %13 = vsyncpa [#allocation5], 0  ;;  %s20_s20 = sshll.u32 %s567_s0, 4  ;;  %s21_s20 = int_to_ptr.vmem [resolvable:$true] %s20_s20 }
   0x3   :  { %s342_s21 = scalar_lea.vmem %s21_s20, 16  ;;  %p347_p1 = scmp.lt.s32.totalorder %s21_s20, %s21_s20 }
   0x4   :  { %p343_p0 = scmp.ne.s32.totalorder %s21_s20, %s342_s21  ;;  %p348_p2 = scmp.lt.s32.totalorder %s342_s21, %s342_s21 }
   0x6   :  { %p349_p3 = por %p348_p2, %p347_p1 }
   0x8   :  { %p350_p4 = pnand %p349_p3, %p343_p0 }
   0xa   :  { %353 = shalt.err (!%p350_p4)
}
   0xb   :  { %s456_s22 = smov [#allocation3]   ;;  %s457_s23 = smov [#allocation7]  }
   0xc   :  { %23 = dma.vmem_to_smem %s21_s20, 16, %s456_s22, [#allocation6]  }
   0xd   :  { %s30_s24 = sshll.u32 %s457_s23, 4  ;;  %s354_s27 = scalar_lea.hbm %s568_s1, 128  ;;  %s31_s24 = int_to_ptr.vmem [resolvable:$true] %s30_s24 }
   0xe   :  { %p355_p5 = scmp.ne.s32.totalorder %s568_s1, %s354_s27  ;;  %p358_p6 = scmp.lt.u32.totalorder %s354_s27, %s568_s1 }
  0x10   :  { %p360_p7 = pnand %p358_p6, %p355_p5 }
  0x12   :  { %363 = shalt.err (!%p360_p7)
}
  0x13   :  { %s364_s6 = scalar_lea.vmem %s31_s24, 128  ;;  %p369_p9 = scmp.lt.s32.totalorder %s31_s24, %s31_s24 }
  0x14   :  { %p365_p8 = scmp.ne.s32.totalorder %s31_s24, %s364_s6  ;;  %p370_p10 = scmp.lt.s32.totalorder %s364_s6, %s364_s6 }
  0x16   :  { %p371_p11 = por %p370_p10, %p369_p9 }
  0x18   :  { %p372_p12 = pnand %p371_p11, %p365_p8 }
  0x1a   :  { %375 = shalt.err (!%p372_p12)
}
  0x1b   :  { %33 = dma.hbm_to_vmem [thread:$0]  %s568_s1, 128, %s31_s24, [#allocation4]  }
  0x1c   :  { %446 = dma.done.wait [#allocation6], 16  }
  0x1d   :  { %447 = vsyncadd [#allocation6], 4294967280 }
  0x1e   :  { %448 = dma.done.wait [#allocation4], 128  }
  0x1f   :  { %449 = vsyncadd [#allocation4], 4294967168 }
  0x20   :  { %44 = sfence }
  0x21   :  { %v47_v0 = vld [vmem:[#allocation7] sm:$0xff]  ;;  %vm48_vm0 = vcmask 261120   ;;  %v458_v1 = vmov 0.0   ;;  %vm459_vm1 = vmmov 0   ;;  %s127_s1 = sld [smem:[#allocation3]]  ;;  %s309_s11 = sld [smem:[#allocation3 + $0x1]] }
  0x22   :  { %321 = vmatprep.subr.mxu0 %v458_v1  ;;  %323 = vmatprep.mubr.msk.f32.mxu0 %vm459_vm1, %v458_v1  ;;  %v46_v2 = vld [vmem:[%s570_s3] sm:$0x3]  ;;  %vm125_vm2 = vcmask 58368  }
  0x23   :  { %322 = vmatpush3.xpose.msk.msra.mxu0 %vm48_vm0, %v47_v0 }
  0x26   :  { %324 = vmatmul.mubr.msk.f32.vlgmr.msra.gmra.mrb[0].mxu0 %vm48_vm0, %v46_v2 }
  0x27   :  { %p128_p13 = scmp.ge.s32.totalorder %s127_s1, 0  ;;  %p130_p0 = scmp.lt.s32.totalorder %s127_s1, 8 }
  0x28   :  { %p134_p1 = scmp.ge.s32.totalorder %s309_s11, 0  ;;  %p135_p2 = scmp.lt.s32.totalorder %s309_s11, 8 }
  0x29   :  { %p131_p3 = pnand %p130_p0, %p128_p13 }
  0x2a   :  { %p136_p4 = pnand %p135_p2, %p134_p1 }
  0x2b   :  { %p132_p5 = pneg %p131_p3 }
  0x2c   :  { %p137_p6 = pneg %p136_p4 }
  0x2e   :  { %p138_p7 = por %p137_p6, %p132_p5 }
  0x2f   :  { %v143_v5 = vld [vmem:[%s569_s2] sm:$0x3] (%p138_p7)  ;;  %v460_v6 = vmov (%p138_p7), 0.0   ;;  %vm461_vm3 = vmmov (%p138_p7), 0   ;;  %v462_v8 = vmov (%p138_p7), 0   ;;  %v463_v11 = vmov (%p138_p7), 1  }
  0x30   :  { %326 = vmatprep.subr.mxu0 (%p138_p7), %v460_v6  ;;  %328 = vmatprep.mubr.msk.f32.mxu0 (%p138_p7), %vm461_vm3, %v460_v6  ;;  %v142_v7 = vld [vmem:[%s570_s3] sm:$0x3] (%p138_p7)  ;;  %s223_s16 = sld [smem:[#allocation3]] (%p138_p7)  ;;  %s312_s17 = sld [smem:[#allocation3 + $0x1]] (%p138_p7)  ;;  %v220_v12 = vlaneseq (%p138_p7) }
  0x31   :  { %327 = vmatpush3.xpose.msk.msra.mxu0 (%p138_p7), %vm48_vm0, %v143_v5  ;;  %340 = vset.pattern.permute.xlu0 (%p138_p7), %v462_v8 }
  0x32   :  { %v221_v13 = vand.u32 (%p138_p7), 127, %v220_v12 }
  0x36   :  { %v225_v14 = vstv (%p138_p7), %s223_s16  ;;  %v235_v16 = vstv (%p138_p7), %s312_s17 }
  0x37   :  { %vm226_vm4 = vcmp.eq.s32.totalorder (%p138_p7), %v221_v13, %v225_v14  ;;  %vm236_vm5 = vcmp.eq.s32.totalorder (%p138_p7), %v221_v13, %v235_v16 }
  0xf4   :  { %141 = sbr.rel (!%p138_p7) target bundleno = 597 (0x255), region = 29 }
  0xf9   :  { %v121_v3 = vpop.f32.mrb[0].mxu0 }
  0xfa   :  { %126 = vst.msk [vmem:[#allocation8] sm:$0x3] %vm125_vm2, %v121_v3  ;;  %v325_v4 = vpop.f32.mrb[1].mxu0  ;;  %329 = vmatmul.mubr.msk.f32.vlgmr.msra.gmra.mrb[0].mxu0 (%p138_p7), %vm48_vm0, %v142_v7 }
 0x101   :  { %v222_v17 = vld [vmem:[#allocation8] sm:$0x3] }
 0x1cd   :  { %v216_v9 = vpop.f32.mrb[0].mxu0 }
 0x1ce   :  { %229 = vperm.xlu0 %340, %v216_v9   ;;  %v330_v10 = vpop.f32.mrb[1].mxu0 }
 0x1d2   :  { %341 = vset.pattern.permute.xlu0 %v463_v11 }
 0x1d3   :  { %238 = vperm.xlu0 %341, %v216_v9  }
 0x24d   :  { %v230_v15 = vpop.permute.xlu0 %229 }
 0x24e   :  { %v232_v18 = vsel %vm226_vm4, %v230_v15, %v222_v17 }
 0x252   :  { %v239_v19 = vpop.permute.xlu0 %238 }
 0x253   :  { %v241_v20 = vsel %vm236_vm5, %v239_v19, %v232_v18 }
 0x254   :  { %242 = vst.msk [vmem:[#allocation8] sm:$0x3] %vm125_vm2, %v241_v20 }
 0x255 PF:  { %s247_s3 = sld [smem:[#allocation3]]  ;;  %s257_s20 = sshll.u32 %s569_s2, 4  ;;  %s528_s20 = int_to_ptr.vmem [resolvable:$true] %s257_s20 }
 0x256   :  { %s376_s25 = scalar_lea.vmem %s528_s20, 16  ;;  %s380_s26 = scalar_lea.vmem %s528_s20, 32 }
 0x257   :  { %p377_p8 = scmp.ne.s32.totalorder %s528_s20, %s376_s25  ;;  %p381_p9 = scmp.lt.s32.totalorder %s528_s20, %s528_s20 }
 0x258   :  { %p382_p10 = scmp.lt.s32.totalorder %s380_s26, %s376_s25 }
 0x25a   :  { %p383_p11 = por %p382_p10, %p381_p9 }
 0x25b   :  { %s313_s21 = sshll.u32 %s247_s3, 4 }
 0x25c   :  { %s249_s24 = scalar_lea.hbm %s572_s5, %s313_s21  ;;  %p384_p12 = pnand %p383_p11, %p377_p8 }
 0x25e   :  { %387 = shalt.err (!%p384_p12)  }
 0x25f   :  { %s388_s27 = scalar_lea.hbm %s249_s24, 16  ;;  %s390_s0 = scalar_lea.hbm %s572_s5, 128 }
 0x260   :  { %p389_p13 = scmp.ne.s32.totalorder %s249_s24, %s388_s27  ;;  %p391_p0 = scmp.lt.u32.totalorder %s249_s24, %s572_s5 }
 0x261   :  { %p392_p1 = scmp.lt.u32.totalorder %s390_s0, %s388_s27  ;;  %p394_p3 = scmp.lt.u32.totalorder %s388_s27, %s249_s24 }
 0x263   :  { %p393_p2 = por %p392_p1, %p391_p0 }
 0x265   :  { %p395_p4 = por %p394_p3, %p393_p2 }
 0x267   :  { %p396_p5 = pnand %p395_p4, %p389_p13 }
 0x269   :  { %399 = shalt.err (!%p396_p5)  }
 0x26a   :  { %260 = dma.vmem_to_hbm [thread:$0]  %s528_s20, 16, %s249_s24, [#allocation2] }
 0x26b   :  { %450 = dma.done.wait [#allocation2], 16 }
 0x26c   :  { %451 = vsyncadd [#allocation2], 4294967280  ;;  %s265_s9 = scalar_lea.vmem %s569_s2, 1  ;;  %s314_s10 = sld [smem:[#allocation3 + $0x1]] }
 0x26d   :  { %s275_s1 = sshll.u32 %s265_s9, 4  ;;  %s276_s1 = int_to_ptr.vmem [resolvable:$true] %s275_s1 }
 0x26e   :  { %s400_s15 = scalar_lea.vmem %s276_s1, 16  ;;  %p405_p7 = scmp.lt.s32.totalorder %s276_s1, %s528_s20 }
 0x26f   :  { %p401_p6 = scmp.ne.s32.totalorder %s276_s1, %s400_s15  ;;  %p406_p8 = scmp.lt.s32.totalorder %s380_s26, %s400_s15 }
 0x271   :  { %p407_p9 = por %p406_p8, %p405_p7 }
 0x272   :  { %s315_s11 = sshll.u32 %s314_s10, 4 }
 0x273   :  { %s267_s14 = scalar_lea.hbm %s572_s5, %s315_s11  ;;  %p408_p10 = pnand %p407_p9, %p401_p6 }
 0x275   :  { %411 = shalt.err (!%p408_p10)  }
 0x276   :  { %s412_s16 = scalar_lea.hbm %s267_s14, 16  ;;  %p415_p12 = scmp.lt.u32.totalorder %s267_s14, %s572_s5 }
 0x277   :  { %p413_p11 = scmp.ne.s32.totalorder %s267_s14, %s412_s16  ;;  %p416_p13 = scmp.lt.u32.totalorder %s390_s0, %s412_s16 }
 0x278   :  { %p418_p1 = scmp.lt.u32.totalorder %s412_s16, %s267_s14 }
 0x279   :  { %p417_p0 = por %p416_p13, %p415_p12 }
 0x27b   :  { %p419_p2 = por %p418_p1, %p417_p0 }
 0x27d   :  { %p420_p3 = pnand %p419_p2, %p413_p11 }
 0x27f   :  { %423 = shalt.err (!%p420_p3)  }
 0x280   :  { %278 = dma.vmem_to_hbm [thread:$0]  %s276_s1, 16, %s267_s14, [#allocation2] }
 0x281   :  { %452 = dma.done.wait [#allocation2], 16 }
 0x282   :  { %453 = vsyncadd [#allocation2], 4294967280  ;;  %s464_s2 = smov [#allocation8]  }
 0x283   :  { %s287_s18 = sshll.u32 %s464_s2, 4  ;;  %s288_s18 = int_to_ptr.vmem [resolvable:$true] %s287_s18 }
 0x284   :  { %s424_s19 = scalar_lea.vmem %s288_s18, 32  ;;  %p429_p5 = scmp.lt.s32.totalorder %s288_s18, %s288_s18 }
 0x285   :  { %p425_p4 = scmp.ne.s32.totalorder %s288_s18, %s424_s19  ;;  %p430_p6 = scmp.lt.s32.totalorder %s424_s19, %s424_s19 }
 0x287   :  { %p431_p7 = por %p430_p6, %p429_p5 }
 0x289   :  { %p432_p8 = pnand %p431_p7, %p425_p4 }
 0x28b   :  { %435 = shalt.err (!%p432_p8)
}
 0x28c   :  { %s436_s21 = scalar_lea.hbm %s571_s4, 32 }
 0x28d   :  { %p437_p9 = scmp.ne.s32.totalorder %s571_s4, %s436_s21  ;;  %p440_p10 = scmp.lt.u32.totalorder %s436_s21, %s571_s4 }
 0x28f   :  { %p442_p11 = pnand %p440_p10, %p437_p9 }
 0x291   :  { %445 = shalt.err (!%p442_p11)
}
 0x292   :  { %290 = dma.vmem_to_hbm [thread:$0]  %s288_s18, 32, %s571_s4, [#allocation5]  }
 0x293   :  { %454 = dma.done.wait [#allocation5], 32  }
 0x294   :  { %455 = vsyncadd [#allocation5], 4294967264 }
 0x295   :  { %294 = vsyncpa [#allocation4], 1 }
 0x296   :  { %295 = vsyncpa [#allocation5], 1 }
 0x297   :  { %296 = vsyncpa [#allocation6], 1 }
 0x298   :  { %297 = vsyncmov [#allocation2] }
 0x29b   :  { %s298_s28 = vpop.sfrf %297 }
 0x29c   :  { %p316_p12 = scmp.ne.s32.totalorder %s298_s28, 0 }
 0x29e   :  { %302 = shalt.err (%p316_p12)  }

</bundles_post_ra>
